<compile_context>
chip_gen: v7x
topology: tpu7x:2x2x1
jax: 0.10.0
libtpu: 0.0.40
codegen_flags: <defaults>
</compile_context>

<pallas_src>
import functools

import numpy as np
import jax
import jax.numpy as jnp
from jax.experimental import pallas as pl
from jax.experimental.pallas import tpu as pltpu


# ---------------------------------------------------------------------------
# Parameter setup (glue, plain numpy; cached per configuration)
# ---------------------------------------------------------------------------
def _make_cubic_kernels(scale_factor: int, a: float = -0.75) -> np.ndarray:
    """kernels[d] = cubic @ [1, t, t^2, t^3] with t = d / scale_factor, shape (s, 4)."""
    cubic = np.array(
        [[0.0, a, -2.0 * a, a],
         [1.0, 0.0, -(a + 3.0), a + 2.0],
         [0.0, -a, 2.0 * a + 3.0, -(a + 2.0)],
         [0.0, 0.0, a, -a]],
        dtype=np.float32,
    )
    ks = []
    for d in range(scale_factor):
        t = float(d) / float(scale_factor)
        tv = np.array([1.0, t, t * t, t * t * t], dtype=np.float32)
        ks.append(cubic @ tv)
    return np.stack(ks, axis=0).astype(np.float32)  # (s, 4)


def _make_folded_upsample_matrix(length: int, s: int, kernels: np.ndarray) -> np.ndarray:
    """A[y*s + d, :] applies kernels[d] around source row y, with the replicate
    padding (1 before, 2 after) folded into the boundary columns.  (length*s, length)."""
    Apad = np.zeros((length * s, length + 3), dtype=np.float32)
    for y in range(length):
        for d in range(s):
            Apad[y * s + d, y:y + 4] = kernels[d]
    A = np.zeros((length * s, length), dtype=np.float32)
    for p in range(length + 3):
        src = min(max(p - 1, 0), length - 1)   # padded row p <- source row clamp(p-1)
        A[:, src] += Apad[:, p]
    return A


@functools.lru_cache(maxsize=64)
def _build_matrices(h: int, w: int, s: int, a: float, row_tile: int):
    """Returns (A_w^T (w, w*s), banded A_h (h*s, band), band)."""
    kernels = _make_cubic_kernels(s, a)
    A_w_t = np.ascontiguousarray(_make_folded_upsample_matrix(w, s, kernels).T)
    A_h = _make_folded_upsample_matrix(h, s, kernels)

    out_h = h * s
    rpt = row_tile // s
    band = min(h, rpt + 3)
    n_row_blocks = out_h // row_tile
    A_h_band = np.zeros((out_h, band), dtype=np.float32)
    for j in range(n_row_blocks):
        st = int(np.clip(j * rpt - 1, 0, h - band))
        blk = A_h[j * row_tile:(j + 1) * row_tile]
        A_h_band[j * row_tile:(j + 1) * row_tile] = blk[:, st:st + band]
        mask = np.ones(h, dtype=bool)
        mask[st:st + band] = False
        assert not np.any(blk[:, mask]), "bicubic band window missed a nonzero tap"
    return A_w_t, A_h_band, band


# ---------------------------------------------------------------------------
# Tile / VMEM sizing (generation-aware)
# ---------------------------------------------------------------------------
def _vmem_budget_bytes():
    """(tile-selection budget, hard cap for vmem_limit_bytes)."""
    try:
        cap = int(pltpu.get_tpu_info().vmem_capacity_bytes)
    except Exception:
        cap = 64 << 20   # conservative: v7x has 64 MiB of VMEM per TensorCore
    return int(cap * 0.70), int(cap * 0.85)


def _tensorcores_per_chip() -> int:
    try:
        kind = jax.devices()[0].device_kind.lower()
    except Exception:
        return 1
    return 2 if any(t in kind for t in ("v4", "v5p", "v7")) else 1


def _use_lane_fold(B: int, out_w: int) -> bool:
    # Fold planes into lanes only when the per-plane output is lane-sparse.
    return out_w < 128 and B > 1


def _estimate_vmem_bytes(B, Tr, band, h, w, s, in_isz, out_isz) -> int:
    out_w = w * s
    fold = _use_lane_fold(B, out_w)
    dbuf = 2 * (B * h * w * in_isz           # input plane block (double-buffered)
                + w * out_w * in_isz         # A_w^T
                + Tr * band * in_isz         # banded A_h row tile
                + B * Tr * out_w * out_isz)  # output block
    tmp = B * band * out_w * 4               # f32 horizontal-pass intermediates
    tmp += Tr * out_w * 4 * (B if fold else 1)   # f32 vertical-pass result before cast
    if fold:
        tmp += B * band * out_w * in_isz     # concatenated mid copy
    return dbuf + tmp


def _select_tiles(planes, h, w, s, in_isz, out_isz, budget, max_row_tile, two_cores):
    out_h = h * s
    cands = [t for t in range(min(max_row_tile, out_h), 7, -1)
             if out_h % t == 0 and t % s == 0 and t % 8 == 0]
    if out_h <= max_row_tile and out_h not in cands:
        cands.insert(0, out_h)
    if not cands:
        # TODO(synk): ragged last row-tile for awkward out_h instead of the
        # full-height fallback (joint B/Tr sizing keeps this inside VMEM).
        cands = [out_h]

    divisors = [d for d in range(min(planes, 16), 0, -1) if planes % d == 0]

    def band_of(t):
        return min(h, t // s + 3)

    def fits(d, t):
        return _estimate_vmem_bytes(d, t, band_of(t), h, w, s, in_isz, out_isz) <= budget

    B, Tr = 1, cands[-1]
    found = False
    for t in cands:                      # largest output-row tile first
        for d in divisors:               # then the largest plane block that fits
            if fits(d, t):
                B, Tr, found = d, t, True
                break
        if found:
            break

    # Megacore: prefer an even number of plane blocks on 2-TensorCore chips.
    if two_cores and planes >= 4 and (planes // B) % 2 == 1:
        for d in divisors:
            if d <= B and d >= max(1, B // 2) and (planes // d) % 2 == 0 and fits(d, Tr):
                B = d
                break
    return B, Tr, band_of(Tr)


# ---------------------------------------------------------------------------
# Pallas kernel
# ---------------------------------------------------------------------------
def _bicubic_kernel(x_ref, awt_ref, ahb_ref, out_ref, *, rows_per_tile, band, h, fold):
    # x_ref  : (B, h, w)       raw input planes (replicate padding folded into matrices)
    # awt_ref: (w, w*s)        horizontal upsampling matrix, transposed
    # ahb_ref: (Tr, band)      banded row tile of the vertical upsampling matrix
    # out_ref: (B, Tr, w*s)    or (1, Tr, B*w*s) when `fold`
    B = x_ref.shape[0]
    cdt = ahb_ref.dtype                      # MXU input dtype (bf16 or f32)
    awt = awt_ref[...]
    ahb = ahb_ref[...]

    if band == h:                            # whole plane fits the band -> static slice
        start = None
    else:                                    # first input row feeding this row tile
        j = pl.program_id(1)
        start = jnp.clip(j * rows_per_tile - 1, 0, h - band)

    def mid(b):                              # banded horizontal pass, f32 accumulation
        xb = x_ref[b] if start is None else x_ref[b, pl.ds(start, band), :]
        return jnp.dot(xb, awt, preferred_element_type=jnp.float32)

    if fold:
        # Planes folded into the lane dim: one (Tr, band) @ (band, B*w*s) matmul
        # (full MXU N utilisation) and a single lane-dense store.
        mid_cat = jnp.concatenate([mid(b) for b in range(B)], axis=-1).astype(cdt)
        out_ref[0] = jnp.dot(ahb, mid_cat,
                             preferred_element_type=jnp.float32).astype(out_ref.dtype)
    else:
        for b in range(B):
            out_ref[b] = jnp.dot(ahb, mid(b).astype(cdt),
                                 preferred_element_type=jnp.float32).astype(out_ref.dtype)


# ---------------------------------------------------------------------------
# Wrapper
# ---------------------------------------------------------------------------
@functools.partial(jax.jit,
                   static_argnames=("scale_factor", "a", "use_bf16", "out_dtype",
                                    "max_row_tile"))
def bicubic_upsample(x, scale_factor=4, a=-0.75, use_bf16=True, out_dtype=None,
                     max_row_tile=512):
    """Pallas TPU implementation of BicubicUpsample.forward (NCHW in, NCHW out)."""
    n, c, h, w = x.shape
    s = int(scale_factor)
    out_h, out_w = h * s, w * s
    planes = n * c

    in_dtype = jnp.bfloat16 if use_bf16 else jnp.float32
    odt = x.dtype if out_dtype is None else np.dtype(out_dtype)
    isz = np.dtype(in_dtype).itemsize
    osz = np.dtype(odt).itemsize

    budget, hard_cap = _vmem_budget_bytes()
    two_cores = _tensorcores_per_chip() >= 2
    B, Tr, band = _select_tiles(planes, h, w, s, isz, osz, budget,
                                int(max_row_tile), two_cores)
    rows_per_tile = Tr // s
    n_plane_blocks = planes // B
    n_row_blocks = out_h // Tr
    fold = _use_lane_fold(B, out_w)

    A_w_t, A_h_band, band2 = _build_matrices(h, w, s, float(a), Tr)
    assert band2 == band

    xr = x.reshape(planes, h, w).astype(in_dtype)
    awt = jnp.asarray(A_w_t, dtype=in_dtype)      # constants under jit
    ahb = jnp.asarray(A_h_band, dtype=in_dtype)

    est = _estimate_vmem_bytes(B, Tr, band, h, w, s, isz, osz)
    vmem_limit = int(min(max(int(est * 1.4), 32 << 20), hard_cap))

    kern = functools.partial(_bicubic_kernel, rows_per_tile=rows_per_tile,
                             band=band, h=h, fold=fold)
    in_specs = [
        pl.BlockSpec((B, h, w), lambda i, j: (i, 0, 0)),   # plane block, resident per i
        pl.BlockSpec((w, out_w), lambda i, j: (0, 0)),     # A_w^T, fetched once
        pl.BlockSpec((Tr, band), lambda i, j: (j, 0)),     # banded A_h row tile
    ]
    cparams = pltpu.CompilerParams(
        dimension_semantics=("parallel", "parallel"),
        vmem_limit_bytes=vmem_limit,
    )

    if fold:
        out = pl.pallas_call(
            kern,
            out_shape=jax.ShapeDtypeStruct((n_plane_blocks, out_h, B * out_w), odt),
            grid_spec=pltpu.PrefetchScalarGridSpec(
                num_scalar_prefetch=0,
                grid=(n_plane_blocks, n_row_blocks),
                in_specs=in_specs,
                out_specs=pl.BlockSpec((1, Tr, B * out_w), lambda i, j: (i, j, 0)),
            ),
            compiler_params=cparams,
        )(xr, awt, ahb)
        out = out.reshape(n_plane_blocks, out_h, B, out_w)
        out = jnp.transpose(out, (0, 2, 1, 3))           # unfold planes from lanes
        return out.reshape(n, c, out_h, out_w)

    out = pl.pallas_call(
        kern,
        out_shape=jax.ShapeDtypeStruct((planes, out_h, out_w), odt),
        grid_spec=pltpu.PrefetchScalarGridSpec(
            num_scalar_prefetch=0,
            grid=(n_plane_blocks, n_row_blocks),
            in_specs=in_specs,
            out_specs=pl.BlockSpec((B, Tr, out_w), lambda i, j: (i, j, 0)),
        ),
        compiler_params=cparams,
    )(xr, awt, ahb)
    return out.reshape(n, c, out_h, out_w)


# ---------------------------------------------------------------------------
# Pure-numpy reference (direct form of the two grouped convs in the module)
# ---------------------------------------------------------------------------
def _reference(x_np: np.ndarray, s: int, a: float) -> np.ndarray:
    n, c, h, w = x_np.shape
    k = _make_cubic_kernels(s, a)
    xp = np.pad(x_np, ((0, 0), (0, 0), (1, 2), (1, 2)), mode="edge")
    out = np.zeros((n, c, h * s, w * s), dtype=np.float32)
    for dy in range(s):
        for dx in range(s):
            acc = np.zeros((n, c, h, w), dtype=np.float32)
            for i in range(4):
                for j in range(4):
                    acc += k[dy, i] * k[dx, j] * xp[:, :, i:i + h, j:j + w]
            out[:, :, dy::s, dx::s] = acc
    return out


if __name__ == "__main__":
    k0, k1, k2 = jax.random.split(jax.random.PRNGKey(0), 3)
    s = 4

    # 1) Canonical small shape, f32 MXU path, planes folded into lanes (out_w < 128).
    x1 = jax.random.normal(k0, (2, 4, 16, 16), dtype=jnp.float32)
    y1 = jax.block_until_ready(bicubic_upsample(x1, scale_factor=s, use_bf16=False))
    assert y1.shape == (2, 4, 64, 64), y1.shape
    np.testing.assert_allclose(np.asarray(y1), _reference(np.asarray(x1), s, -0.75),
                               rtol=1e-4, atol=1e-4)

    # 2) Default bf16 MXU path with multiple banded row tiles (dynamic band start).
    x2 = jax.random.normal(k1, (1, 2, 32, 24), dtype=jnp.float32)
    y2 = jax.block_until_ready(bicubic_upsample(x2, scale_factor=s, max_row_tile=64))
    assert y2.shape == (1, 2, 128, 96), y2.shape
    np.testing.assert_allclose(np.asarray(y2), _reference(np.asarray(x2), s, -0.75),
                               rtol=5e-2, atol=1e-1)

    # 3) Lane-dense per-plane output (out_w >= 128), f32.
    x3 = jax.random.normal(k2, (1, 2, 16, 32), dtype=jnp.float32)
    y3 = jax.block_until_ready(bicubic_upsample(x3, scale_factor=s, use_bf16=False))
    assert y3.shape == (1, 2, 64, 128), y3.shape
    np.testing.assert_allclose(np.asarray(y3), _reference(np.asarray(x3), s, -0.75),
                               rtol=1e-4, atol=1e-4)

    print("KERNEL_OK")
</pallas_src>

<mosaic_0001>
module attributes {stable_mosaic.version = 11 : i64} {
  func.func @_bicubic_kernel(%arg0: i32, %arg1: i32, %arg2: memref<8x16x16xf32, #tpu.memory_space<vmem>>, %arg3: memref<16x64xf32, #tpu.memory_space<vmem>>, %arg4: memref<64x16xf32, #tpu.memory_space<vmem>>, %arg5: memref<1x64x512xf32, #tpu.memory_space<vmem>>) attributes {dimension_semantics = [#tpu.dimension_semantics<parallel>, #tpu.dimension_semantics<parallel>], iteration_bounds = array<i64: 1, 1>, scalar_prefetch = 0 : i64, scratch_operands = 0 : i64, tpu.core_type = #tpu.core_type<tc>, window_params = [{transform_indices = @transform_0, window_bounds = array<i64: 8, 16, 16>}, {pipeline_mode = #tpu.pipeline_mode<synchronous>, transform_indices = @transform_1, window_bounds = array<i64: 16, 64>}, {transform_indices = @transform_2, window_bounds = array<i64: 64, 16>}, {transform_indices = @transform_3, window_bounds = array<i64: 1, 64, 512>}]} {
    %c0 = arith.constant 0 : index
    %c0_0 = arith.constant 0 : index
    %0 = vector.load %arg3[%c0, %c0_0] : memref<16x64xf32, #tpu.memory_space<vmem>>, vector<16x64xf32>
    %c0_1 = arith.constant 0 : index
    %c0_2 = arith.constant 0 : index
    %1 = vector.load %arg4[%c0_1, %c0_2] : memref<64x16xf32, #tpu.memory_space<vmem>>, vector<64x16xf32>
    %c0_3 = arith.constant 0 : index
    %c0_4 = arith.constant 0 : index
    %c0_5 = arith.constant 0 : index
    %2 = vector.load %arg2[%c0_3, %c0_4, %c0_5] : memref<8x16x16xf32, #tpu.memory_space<vmem>>, vector<1x16x16xf32>
    %3 = vector.shape_cast %2 : vector<1x16x16xf32> to vector<16x16xf32>
    %cst = arith.constant dense<0.000000e+00> : vector<16x64xf32>
    %4 = tpu.matmul %3, %0, %cst {dimension_numbers = #tpu.dot_dimension_numbers<[1], [0], [0], [1], [0, 0, 1, 1], [], []>} : vector<16x16xf32>, vector<16x64xf32>, vector<16x64xf32> -> vector<16x64xf32>
    %c1 = arith.constant 1 : index
    %c0_6 = arith.constant 0 : index
    %c0_7 = arith.constant 0 : index
    %5 = vector.load %arg2[%c1, %c0_6, %c0_7] : memref<8x16x16xf32, #tpu.memory_space<vmem>>, vector<1x16x16xf32>
    %6 = vector.shape_cast %5 : vector<1x16x16xf32> to vector<16x16xf32>
    %cst_8 = arith.constant dense<0.000000e+00> : vector<16x64xf32>
    %7 = tpu.matmul %6, %0, %cst_8 {dimension_numbers = #tpu.dot_dimension_numbers<[1], [0], [0], [1], [0, 0, 1, 1], [], []>} : vector<16x16xf32>, vector<16x64xf32>, vector<16x64xf32> -> vector<16x64xf32>
    %c2 = arith.constant 2 : index
    %c0_9 = arith.constant 0 : index
    %c0_10 = arith.constant 0 : index
    %8 = vector.load %arg2[%c2, %c0_9, %c0_10] : memref<8x16x16xf32, #tpu.memory_space<vmem>>, vector<1x16x16xf32>
    %9 = vector.shape_cast %8 : vector<1x16x16xf32> to vector<16x16xf32>
    %cst_11 = arith.constant dense<0.000000e+00> : vector<16x64xf32>
    %10 = tpu.matmul %9, %0, %cst_11 {dimension_numbers = #tpu.dot_dimension_numbers<[1], [0], [0], [1], [0, 0, 1, 1], [], []>} : vector<16x16xf32>, vector<16x64xf32>, vector<16x64xf32> -> vector<16x64xf32>
    %c3 = arith.constant 3 : index
    %c0_12 = arith.constant 0 : index
    %c0_13 = arith.constant 0 : index
    %11 = vector.load %arg2[%c3, %c0_12, %c0_13] : memref<8x16x16xf32, #tpu.memory_space<vmem>>, vector<1x16x16xf32>
    %12 = vector.shape_cast %11 : vector<1x16x16xf32> to vector<16x16xf32>
    %cst_14 = arith.constant dense<0.000000e+00> : vector<16x64xf32>
    %13 = tpu.matmul %12, %0, %cst_14 {dimension_numbers = #tpu.dot_dimension_numbers<[1], [0], [0], [1], [0, 0, 1, 1], [], []>} : vector<16x16xf32>, vector<16x64xf32>, vector<16x64xf32> -> vector<16x64xf32>
    %c4 = arith.constant 4 : index
    %c0_15 = arith.constant 0 : index
    %c0_16 = arith.constant 0 : index
    %14 = vector.load %arg2[%c4, %c0_15, %c0_16] : memref<8x16x16xf32, #tpu.memory_space<vmem>>, vector<1x16x16xf32>
    %15 = vector.shape_cast %14 : vector<1x16x16xf32> to vector<16x16xf32>
    %cst_17 = arith.constant dense<0.000000e+00> : vector<16x64xf32>
    %16 = tpu.matmul %15, %0, %cst_17 {dimension_numbers = #tpu.dot_dimension_numbers<[1], [0], [0], [1], [0, 0, 1, 1], [], []>} : vector<16x16xf32>, vector<16x64xf32>, vector<16x64xf32> -> vector<16x64xf32>
    %c5 = arith.constant 5 : index
    %c0_18 = arith.constant 0 : index
    %c0_19 = arith.constant 0 : index
    %17 = vector.load %arg2[%c5, %c0_18, %c0_19] : memref<8x16x16xf32, #tpu.memory_space<vmem>>, vector<1x16x16xf32>
    %18 = vector.shape_cast %17 : vector<1x16x16xf32> to vector<16x16xf32>
    %cst_20 = arith.constant dense<0.000000e+00> : vector<16x64xf32>
    %19 = tpu.matmul %18, %0, %cst_20 {dimension_numbers = #tpu.dot_dimension_numbers<[1], [0], [0], [1], [0, 0, 1, 1], [], []>} : vector<16x16xf32>, vector<16x64xf32>, vector<16x64xf32> -> vector<16x64xf32>
    %c6 = arith.constant 6 : index
    %c0_21 = arith.constant 0 : index
    %c0_22 = arith.constant 0 : index
    %20 = vector.load %arg2[%c6, %c0_21, %c0_22] : memref<8x16x16xf32, #tpu.memory_space<vmem>>, vector<1x16x16xf32>
    %21 = vector.shape_cast %20 : vector<1x16x16xf32> to vector<16x16xf32>
    %cst_23 = arith.constant dense<0.000000e+00> : vector<16x64xf32>
    %22 = tpu.matmul %21, %0, %cst_23 {dimension_numbers = #tpu.dot_dimension_numbers<[1], [0], [0], [1], [0, 0, 1, 1], [], []>} : vector<16x16xf32>, vector<16x64xf32>, vector<16x64xf32> -> vector<16x64xf32>
    %c7 = arith.constant 7 : index
    %c0_24 = arith.constant 0 : index
    %c0_25 = arith.constant 0 : index
    %23 = vector.load %arg2[%c7, %c0_24, %c0_25] : memref<8x16x16xf32, #tpu.memory_space<vmem>>, vector<1x16x16xf32>
    %24 = vector.shape_cast %23 : vector<1x16x16xf32> to vector<16x16xf32>
    %cst_26 = arith.constant dense<0.000000e+00> : vector<16x64xf32>
    %25 = tpu.matmul %24, %0, %cst_26 {dimension_numbers = #tpu.dot_dimension_numbers<[1], [0], [0], [1], [0, 0, 1, 1], [], []>} : vector<16x16xf32>, vector<16x64xf32>, vector<16x64xf32> -> vector<16x64xf32>
    %26 = tpu.concatenate %4, %7, %10, %13, %16, %19, %22, %25 in 1 : vector<16x64xf32>, vector<16x64xf32>, vector<16x64xf32>, vector<16x64xf32>, vector<16x64xf32>, vector<16x64xf32>, vector<16x64xf32>, vector<16x64xf32> -> vector<16x512xf32>
    %cst_27 = arith.constant dense<0.000000e+00> : vector<64x512xf32>
    %27 = tpu.matmul %1, %26, %cst_27 {dimension_numbers = #tpu.dot_dimension_numbers<[1], [0], [0], [1], [0, 0, 1, 1], [], []>} : vector<64x16xf32>, vector<16x512xf32>, vector<64x512xf32> -> vector<64x512xf32>
    %c0_28 = arith.constant 0 : index
    %c0_29 = arith.constant 0 : index
    %c0_30 = arith.constant 0 : index
    %28 = vector.load %arg5[%c0_28, %c0_29, %c0_30] : memref<1x64x512xf32, #tpu.memory_space<vmem>>, vector<1x64x512xf32>
    %29 = vector.shape_cast %28 : vector<1x64x512xf32> to vector<64x512xf32>
    %30 = vector.shape_cast %27 : vector<64x512xf32> to vector<1x64x512xf32>
    tpu.vector_store %arg5[%c0_28, %c0_29, %c0_30], %30 {strides = array<i32>} : memref<1x64x512xf32, #tpu.memory_space<vmem>>, vector<1x64x512xf32>,
    return
  }
  func.func @transform_0(%arg0: i32, %arg1: i32) -> (i32, i32, i32) {
    %c0_i32 = arith.constant 0 : i32
    %c0_i32_0 = arith.constant 0 : i32
    %c0_i32_1 = arith.constant 0 : i32
    return %arg0, %c0_i32, %c0_i32_0 : i32, i32, i32
  }
  func.func @transform_1(%arg0: i32, %arg1: i32) -> (i32, i32) {
    %c0_i32 = arith.constant 0 : i32
    %c0_i32_0 = arith.constant 0 : i32
    %c0_i32_1 = arith.constant 0 : i32
    return %c0_i32, %c0_i32_0 : i32, i32
  }
  func.func @transform_2(%arg0: i32, %arg1: i32) -> (i32, i32) {
    %c0_i32 = arith.constant 0 : i32
    %c0_i32_0 = arith.constant 0 : i32
    return %arg1, %c0_i32 : i32, i32
  }
  func.func @transform_3(%arg0: i32, %arg1: i32) -> (i32, i32, i32) {
    %c0_i32 = arith.constant 0 : i32
    %c0_i32_0 = arith.constant 0 : i32
    return %arg0, %arg1, %c0_i32 : i32, i32, i32
  }
}

</mosaic_0001>

<bundles_post_ra>
// kernel: bicubic_upsample.1
= control target key start
LH: loop header
LB: loop body
LE: loop exit
PB: predicated region body
PF: predicated region fallthrough
CT: control target
= control target key end

     0   :  { %8 = vsyncpa [#allocation3], 0  ;;  %s1554_s0 = inlined_call_operand.hbm [shape: f32[8,16,16], index: 0, kind: input, shape index: {}]   ;;  %s1555_s1 = inlined_call_operand.hbm [shape: f32[16,64], index: 1, kind: input, shape index: {}]   ;;  %s1556_s2 = inlined_call_operand.hbm [shape: f32[64,16], index: 2, kind: input, shape index: {}]   ;;  %s1557_s3 = inlined_call_operand.vmem [shape: f32[1,64,512], index: 3, kind: output, shape index: {}]  }
   0x1   :  { %9 = vsyncpa [#allocation5], 0  ;;  %s1323_s12 = smov [#allocation4]   ;;  %s1324_s14 = smov [#allocation2]  }
   0x2   :  { %s27_s13 = sshll.u32 %s1323_s12, 4  ;;  %s15_s15 = sshll.u32 %s1324_s14, 4  ;;  %s28_s13 = int_to_ptr.vmem [resolvable:$true] %s27_s13  ;;  %s1350_s15 = int_to_ptr.vmem [resolvable:$true] %s15_s15 }
   0x3   :  { %s1253_s18 = scalar_lea.hbm %s1555_s1, 256 }
   0x4   :  { %p1254_p0 = scmp.ne.s32.totalorder %s1555_s1, %s1253_s18  ;;  %p1257_p1 = scmp.lt.u32.totalorder %s1253_s18, %s1555_s1 }
   0x6   :  { %p1259_p2 = pnand %p1257_p1, %p1254_p0 }
   0x8   :  { %1262 = shalt.err (!%p1259_p2)
}
   0x9   :  { %s1263_s23 = scalar_lea.vmem %s28_s13, 256  ;;  %p1268_p4 = scmp.lt.s32.totalorder %s28_s13, %s28_s13 }
   0xa   :  { %p1264_p3 = scmp.ne.s32.totalorder %s28_s13, %s1263_s23  ;;  %p1269_p5 = scmp.lt.s32.totalorder %s1263_s23, %s1263_s23 }
   0xc   :  { %p1270_p6 = por %p1269_p5, %p1268_p4 }
   0xe   :  { %p1271_p7 = pnand %p1270_p6, %p1264_p3 }
  0x10   :  { %1274 = shalt.err (!%p1271_p7)
}
  0x11   :  { %s1325_s24 = smov 128   ;;  %s1326_s25 = smov 8  }
  0x12   :  { %33 = dma.hbm_to_vmem [thread:$0]  %s1555_s1, 256, %s28_s13, [#allocation5], %s1325_s24, %s1325_s24, %s1326_s25  }
  0x13   :  { %s1275_s30 = scalar_lea.hbm %s1554_s0, 2048 }
  0x14   :  { %p1276_p8 = scmp.ne.s32.totalorder %s1554_s0, %s1275_s30  ;;  %p1279_p9 = scmp.lt.u32.totalorder %s1275_s30, %s1554_s0 }
  0x16   :  { %p1281_p10 = pnand %p1279_p9, %p1276_p8 }
  0x18   :  { %1284 = shalt.err (!%p1281_p10)
}
  0x19   :  { %s1285_s8 = scalar_lea.vmem %s1350_s15, 2048  ;;  %p1290_p12 = scmp.lt.s32.totalorder %s1350_s15, %s1350_s15 }
  0x1a   :  { %p1286_p11 = scmp.ne.s32.totalorder %s1350_s15, %s1285_s8  ;;  %p1291_p13 = scmp.lt.s32.totalorder %s1285_s8, %s1285_s8 }
  0x1c   :  { %p1292_p0 = por %p1291_p13, %p1290_p12 }
  0x1e   :  { %p1293_p1 = pnand %p1292_p0, %p1286_p11 }
  0x20   :  { %1296 = shalt.err (!%p1293_p1)
}
  0x21   :  { %21 = dma.hbm_to_vmem [thread:$0]  %s1554_s0, 2048, %s1350_s15, [#allocation3], %s1325_s24, %s1325_s24, %s1326_s25  }
  0x22   :  { %s1327_s10 = smov [#allocation6]   ;;  %s1297_s14 = scalar_lea.hbm %s1556_s2, 1024 }
  0x23   :  { %s39_s11 = sshll.u32 %s1327_s10, 4  ;;  %p1298_p2 = scmp.ne.s32.totalorder %s1556_s2, %s1297_s14  ;;  %s40_s11 = int_to_ptr.vmem [resolvable:$true] %s39_s11 }
  0x24   :  { %p1301_p3 = scmp.lt.u32.totalorder %s1297_s14, %s1556_s2 }
  0x26   :  { %p1303_p4 = pnand %p1301_p3, %p1298_p2 }
  0x28   :  { %1306 = shalt.err (!%p1303_p4)
}
  0x29   :  { %s1307_s20 = scalar_lea.vmem %s40_s11, 1024  ;;  %p1312_p6 = scmp.lt.s32.totalorder %s40_s11, %s40_s11 }
  0x2a   :  { %p1308_p5 = scmp.ne.s32.totalorder %s40_s11, %s1307_s20  ;;  %p1313_p7 = scmp.lt.s32.totalorder %s1307_s20, %s1307_s20 }
  0x2c   :  { %p1314_p8 = por %p1313_p7, %p1312_p6 }
  0x2e   :  { %p1315_p9 = pnand %p1314_p8, %p1308_p5 }
  0x30   :  { %1318 = shalt.err (!%p1315_p9)
}
  0x31   :  { %45 = dma.hbm_to_vmem [thread:$0]  %s1556_s2, 1024, %s40_s11, [#allocation5], %s1325_s24, %s1325_s24, %s1326_s25  }
  0x32   :  { %1319 = dma.done.wait [#allocation3], 2048  }
  0x33   :  { %1320 = vsyncadd [#allocation3], 4294965248 }
  0x34   :  { %1321 = dma.done.wait [#allocation5], 1280  }
  0x35   :  { %1322 = vsyncadd [#allocation5], 4294966016  ;;  %vm67_vm0 = vcmask 130048   ;;  %v55_v0 = vld [vmem:[#allocation4] sm:$0xff]  ;;  %v56_v1 = vld [vmem:[#allocation4 + $0x8] sm:$0xff]  ;;  %s1328_s2 = smov 64  }
  0x36   :  { %v150_v2 = vld [vmem:[#allocation2 + $0x10] sm:$0xff]  ;;  %v1186_v3 = vpack.c.bf16 %v56_v1, %v55_v0  ;;  %v65_v4 = vld [vmem:[#allocation2] sm:$0xff]  ;;  %v151_v5 = vld [vmem:[#allocation2 + $0x18] sm:$0xff]  ;;  %v1329_v33 = vmov 0.0   ;;  %vm769_vm1 = vcmask 523264  }
  0x37   :  { %1141 = vmatprep.mubr.msk.f32.mxu1 %vm67_vm0, %v150_v2  ;;  %v66_v6 = vld [vmem:[#allocation2 + $0x8] sm:$0xff]  ;;  %v318_v7 = vld [vmem:[#allocation2 + $0x30] sm:$0xff]  ;;  %1134 = vmatprep.mubr.msk.f32.mxu0 %vm67_vm0, %v65_v4  ;;  %v234_v8 = vld [vmem:[#allocation2 + $0x20] sm:$0xff] }
  0x38   :  { %1191 = vmatprep.subr.bf16.mxu1 %v1186_v3  ;;  %1187 = vmatprep.subr.bf16.mxu0 %v1186_v3  ;;  %v319_v9 = vld [vmem:[#allocation2 + $0x38] sm:$0xff]  ;;  %v486_v10 = vld [vmem:[#allocation2 + $0x50] sm:$0xff]  ;;  %v235_v11 = vld [vmem:[#allocation2 + $0x28] sm:$0xff] }
  0x39   :  { %1193 = vmatpush3.bf16.msra.mxu1 %v1186_v3  ;;  %1189 = vmatpush3.bf16.msra.mxu0 %v1186_v3  ;;  %v402_v12 = vld [vmem:[#allocation2 + $0x40] sm:$0xff]  ;;  %v487_v13 = vld [vmem:[#allocation2 + $0x58] sm:$0xff]  ;;  %v654_v14 = vld [vmem:[#allocation2 + $0x70] sm:$0xff] }
  0x3a   :  { %1199 = vmatprep.subr.bf16.mxu1 %v1186_v3  ;;  %1195 = vmatprep.subr.bf16.mxu0 %v1186_v3  ;;  %v403_v15 = vld [vmem:[#allocation2 + $0x48] sm:$0xff]  ;;  %v570_v16 = vld [vmem:[#allocation2 + $0x60] sm:$0xff]  ;;  %v655_v17 = vld [vmem:[#allocation2 + $0x78] sm:$0xff] }
  0x3b   :  { %v571_v18 = vld [vmem:[#allocation2 + $0x68] sm:$0xff]  ;;  %v57_v57 = vld [vmem:[#allocation6] sm:$0xff]  ;;  %v58_v0 = vld [vmem:[#allocation6 + $0x8] sm:$0xff] }
  0x3c   :  { %1142 = vmatmul.mubr.msk.f32.vlgmr.msra.gmra.mrb[0].mxu1 %vm67_vm0, %v151_v5  ;;  %1135 = vmatmul.mubr.msk.f32.vlgmr.msra.gmra.mrb[0].mxu0 %vm67_vm0, %v66_v6  ;;  %v59_v2 = vld [vmem:[#allocation6 + $0x10] sm:$0xff]  ;;  %v61_v4 = vld [vmem:[#allocation6 + $0x20] sm:$0xff]  ;;  %v62_v5 = vld [vmem:[#allocation6 + $0x28] sm:$0xff] }
  0x3d   :  { %1201 = vmatpush3.bf16.msra.mxu1 %v1186_v3  ;;  %1155 = vmatprep.mubr.msk.f32.mxu1 %vm67_vm0, %v318_v7  ;;  %v63_v6 = vld [vmem:[#allocation6 + $0x30] sm:$0xff]  ;;  %v64_v7 = vld [vmem:[#allocation6 + $0x38] sm:$0xff] }
  0x3e   :  { %1207 = vmatprep.subr.bf16.mxu1 %v1186_v3  ;;  %1197 = vmatpush3.bf16.msra.mxu0 %v1186_v3 }
  0x3f   :  { %1148 = vmatprep.mubr.msk.f32.mxu0 %vm67_vm0, %v234_v8  ;;  %1203 = vmatprep.subr.bf16.mxu0 %v1186_v3 }
  0x40   :  { %1156 = vmatmul.mubr.msk.f32.vlgmr.msra.gmra.mrb[2].mxu1 %vm67_vm0, %v319_v9 }
  0x41   :  { %1209 = vmatpush3.bf16.msra.mxu1 %v1186_v3  ;;  %1169 = vmatprep.mubr.msk.f32.mxu1 %vm67_vm0, %v486_v10 }
  0x42   :  { %1215 = vmatprep.subr.bf16.mxu1 %v1186_v3  ;;  %1149 = vmatmul.mubr.msk.f32.vlgmr.msra.gmra.mrb[2].mxu0 %vm67_vm0, %v235_v11 }
  0x43   :  { %1205 = vmatpush3.bf16.msra.mxu0 %v1186_v3  ;;  %1162 = vmatprep.mubr.msk.f32.mxu0 %vm67_vm0, %v402_v12 }
  0x44   :  { %1170 = vmatmul.mubr.msk.f32.vlgmr.msra.gmra.mrb[4].mxu1 %vm67_vm0, %v487_v13  ;;  %1211 = vmatprep.subr.bf16.mxu0 %v1186_v3 }
  0x45   :  { %1217 = vmatpush3.bf16.msra.mxu1 %v1186_v3  ;;  %1183 = vmatprep.mubr.msk.f32.mxu1 %vm67_vm0, %v654_v14 }
  0x46   :  { %1163 = vmatmul.mubr.msk.f32.vlgmr.msra.gmra.mrb[4].mxu0 %vm67_vm0, %v403_v15 }
  0x47   :  { %1213 = vmatpush3.bf16.msra.mxu0 %v1186_v3  ;;  %1176 = vmatprep.mubr.msk.f32.mxu0 %vm67_vm0, %v570_v16  ;;  %v60_v3 = vld [vmem:[#allocation6 + $0x18] sm:$0xff] }
  0x48   :  { %1184 = vmatmul.mubr.msk.f32.vlgmr.msra.gmra.mrb[6].mxu1 %vm67_vm0, %v655_v17 }
  0x49   :  { %979 = vmatprep.mubr.f32.mxu1 %v1329_v33 }
  0x4a   :  { %1177 = vmatmul.mubr.msk.f32.vlgmr.msra.gmra.mrb[6].mxu0 %vm67_vm0, %v571_v18 }
  0x4b   :  { %866 = vmatprep.mubr.f32.mxu0 %v1329_v33 }
 0x10f   :  { %v1143_v19 = vpop.f32.mrb[0].mxu1  ;;  %v1136_v20 = vpop.f32.mrb[0].mxu0 }
 0x110   :  { %v224_v21 = vpop.f32.mrb[1].mxu1  ;;  %v140_v22 = vpop.f32.mrb[1].mxu0 }
 0x111   :  { %v1243_v23 = vpack.i.bf16 %v1143_v19, %v224_v21 }
 0x113   :  { %1244 = vrot.lane.b32.xlu1 %v1243_v23, %s1328_s2  ;;  %v1157_v24 = vpop.f32.mrb[2].mxu1 }
 0x114   :  { %v392_v25 = vpop.f32.mrb[3].mxu1 }
 0x115   :  { %v1233_v26 = vpack.i.bf16 %v1157_v24, %v392_v25  ;;  %v1150_v27 = vpop.f32.mrb[2].mxu0 }
 0x116   :  { %v308_v28 = vpop.f32.mrb[3].mxu0 }
 0x117   :  { %1234 = vrot.lane.b32.xlu0 %v1233_v26, %s1328_s2  ;;  %v1171_v29 = vpop.f32.mrb[4].mxu1 }
 0x118   :  { %v560_v30 = vpop.f32.mrb[5].mxu1 }
 0x119   :  { %v1248_v31 = vpack.i.bf16 %v1171_v29, %v560_v30  ;;  %v1164_v32 = vpop.f32.mrb[4].mxu0 }
 0x11a   :  { %v476_v34 = vpop.f32.mrb[5].mxu0 }
 0x11b   :  { %1249 = vrot.lane.b32.xlu1 %v1248_v31, %s1328_s2  ;;  %v1185_v35 = vpop.f32.mrb[6].mxu1 }
 0x11c   :  { %v728_v36 = vpop.f32.mrb[7].mxu1 }
 0x11d   :  { %v1238_v37 = vpack.i.bf16 %v1185_v35, %v728_v36  ;;  %v1178_v38 = vpop.f32.mrb[6].mxu0 }
 0x11e   :  { %v644_v39 = vpop.f32.mrb[7].mxu0 }
 0x11f   :  { %1239 = vrot.lane.b32.xlu0 %v1238_v37, %s1328_s2 }
 0x185   :  { %v1245_v40 = vpop.permute.xlu1 %1244 }
 0x186   :  { %v1247_v41 = vunpack.i.h.bf16 %v1245_v40  ;;  %v1246_v42 = vunpack.i.l.bf16 %v1245_v40 }
 0x188   :  { %v771_v43 = vsel %vm769_vm1, %v1136_v20, %v1247_v41  ;;  %v770_v44 = vsel %vm769_vm1, %v140_v22, %v1246_v42 }
 0x189   :  { %v1220_v45 = vpack.c.bf16 %v771_v43, %v770_v44  ;;  %v1235_v46 = vpop.permute.xlu0 %1234 }
 0x18a   :  { %v1237_v47 = vunpack.i.h.bf16 %v1235_v46  ;;  %v1236_v48 = vunpack.i.l.bf16 %v1235_v46 }
 0x18c   :  { %v773_v49 = vsel %vm769_vm1, %v1150_v27, %v1237_v47  ;;  %v772_v50 = vsel %vm769_vm1, %v308_v28, %v1236_v48 }
 0x18d   :  { %v1218_v51 = vpack.c.bf16 %v773_v49, %v772_v50  ;;  %v1250_v52 = vpop.permute.xlu1 %1249 }
 0x18e   :  { %v1252_v53 = vunpack.i.h.bf16 %v1250_v52  ;;  %v1251_v54 = vunpack.i.l.bf16 %v1250_v52 }
 0x18f   :  { %1219 = vmatprep.subr.bf16.mxu0 %v1218_v51 }
 0x190   :  { %v775_v55 = vsel %vm769_vm1, %v1164_v32, %v1252_v53  ;;  %v774_v56 = vsel %vm769_vm1, %v476_v34, %v1251_v54  ;;  %1221 = vmatpush1.bf16.msra.mxu0 %v1220_v45 }
 0x191   :  { %v1224_v58 = vpack.c.bf16 %v775_v55, %v774_v56  ;;  %v1240_v59 = vpop.permute.xlu0 %1239 }
 0x192   :  { %v1242_v60 = vunpack.i.h.bf16 %v1240_v59  ;;  %v1241_v61 = vunpack.i.l.bf16 %v1240_v59 }
 0x193   :  { %1082 = vmatmul.mubr.msk.f32.vlgmr.msra.gmra.mrb[8].mxu0 %vm67_vm0, %v57_v57 }
 0x194   :  { %v777_v62 = vsel %vm769_vm1, %v1178_v38, %v1242_v60  ;;  %v776_v63 = vsel %vm769_vm1, %v644_v39, %v1241_v61  ;;  %872 = vmatprep.mubr.f32.mxu0 %v1329_v33 }
 0x195   :  { %v1222_v1 = vpack.c.bf16 %v777_v62, %v776_v63 }
 0x197   :  { %1223 = vmatprep.subr.bf16.mxu1 %v1222_v1  ;;  %1083 = vmatmul.mubr.msk.f32.gmra.mrb[10].mxu0 %vm67_vm0, %v58_v0 }
 0x198   :  { %1225 = vmatpush1.bf16.msra.mxu1 %v1224_v58  ;;  %878 = vmatprep.mubr.f32.mxu0 %v1329_v33 }
 0x19b   :  { %1090 = vmatmul.mubr.msk.f32.vlgmr.msra.gmra.mrb[8].mxu1 %vm67_vm0, %v57_v57  ;;  %1084 = vmatmul.mubr.msk.f32.gmra.mrb[12].mxu0 %vm67_vm0, %v59_v2 }
 0x19c   :  { %985 = vmatprep.mubr.f32.mxu1 %v1329_v33  ;;  %884 = vmatprep.mubr.f32.mxu0 %v1329_v33 }
 0x19f   :  { %1091 = vmatmul.mubr.msk.f32.gmra.mrb[10].mxu1 %vm67_vm0, %v58_v0  ;;  %1085 = vmatmul.mubr.msk.f32.gmra.mrb[14].mxu0 %vm67_vm0, %v60_v3 }
 0x1a0   :  { %991 = vmatprep.mubr.f32.mxu1 %v1329_v33  ;;  %890 = vmatprep.mubr.f32.mxu0 %v1329_v33 }
 0x1a3   :  { %1092 = vmatmul.mubr.msk.f32.gmra.mrb[12].mxu1 %vm67_vm0, %v59_v2  ;;  %1086 = vmatmul.mubr.msk.f32.gmra.mrb[16].mxu0 %vm67_vm0, %v61_v4 }
 0x1a4   :  { %997 = vmatprep.mubr.f32.mxu1 %v1329_v33  ;;  %896 = vmatprep.mubr.f32.mxu0 %v1329_v33 }
 0x1a7   :  { %1093 = vmatmul.mubr.msk.f32.gmra.mrb[14].mxu1 %vm67_vm0, %v60_v3  ;;  %1087 = vmatmul.mubr.msk.f32.gmra.mrb[18].mxu0 %vm67_vm0, %v62_v5 }
 0x1a8   :  { %1003 = vmatprep.mubr.f32.mxu1 %v1329_v33  ;;  %902 = vmatprep.mubr.f32.mxu0 %v1329_v33 }
 0x1ab   :  { %1094 = vmatmul.mubr.msk.f32.gmra.mrb[16].mxu1 %vm67_vm0, %v61_v4  ;;  %1088 = vmatmul.mubr.msk.f32.gmra.mrb[20].mxu0 %vm67_vm0, %v63_v6 }
 0x1ac   :  { %1009 = vmatprep.mubr.f32.mxu1 %v1329_v33  ;;  %908 = vmatprep.mubr.f32.mxu0 %v1329_v33 }
 0x1af   :  { %1095 = vmatmul.mubr.msk.f32.gmra.mrb[18].mxu1 %vm67_vm0, %v62_v5  ;;  %1089 = vmatmul.mubr.msk.f32.gmra.mrb[22].mxu0 %vm67_vm0, %v64_v7 }
 0x1b0   :  { %1015 = vmatprep.mubr.f32.mxu1 %v1329_v33 }
 0x1b3   :  { %1096 = vmatmul.mubr.msk.f32.gmra.mrb[20].mxu1 %vm67_vm0, %v63_v6 }
 0x1b4   :  { %1021 = vmatprep.mubr.f32.mxu1 %v1329_v33 }
 0x1b7   :  { %1097 = vmatmul.mubr.msk.f32.gmra.mrb[22].mxu1 %vm67_vm0, %v64_v7 }
 0x266   :  { %v868_v8 = vpop.f32.mrb[8].mxu0 }
 0x267   :  { %1028 = vst [vmem:[%s1557_s3] sm:$0xff] %v868_v8  ;;  %v870_v9 = vpop.f32.mrb[9].mxu0 }
 0x268   :  { %1029 = vst [vmem:[%s1557_s3 + $0x8] sm:$0xff] %v870_v9 }
 0x26a   :  { %v874_v10 = vpop.f32.mrb[10].mxu0 }
 0x26b   :  { %1032 = vst [vmem:[%s1557_s3 + $0x20] sm:$0xff] %v874_v10  ;;  %v876_v11 = vpop.f32.mrb[11].mxu0 }
 0x26c   :  { %1033 = vst [vmem:[%s1557_s3 + $0x28] sm:$0xff] %v876_v11 }
 0x26e   :  { %v981_v12 = vpop.f32.mrb[8].mxu1  ;;  %v880_v13 = vpop.f32.mrb[12].mxu0 }
 0x26f   :  { %1030 = vst [vmem:[%s1557_s3 + $0x10] sm:$0xff] %v981_v12  ;;  %v983_v14 = vpop.f32.mrb[9].mxu1  ;;  %1036 = vst [vmem:[%s1557_s3 + $0x40] sm:$0xff] %v880_v13  ;;  %v882_v15 = vpop.f32.mrb[13].mxu0 }
 0x270   :  { %1031 = vst [vmem:[%s1557_s3 + $0x18] sm:$0xff] %v983_v14  ;;  %1037 = vst [vmem:[%s1557_s3 + $0x48] sm:$0xff] %v882_v15 }
 0x272   :  { %v987_v16 = vpop.f32.mrb[10].mxu1  ;;  %v886_v17 = vpop.f32.mrb[14].mxu0 }
 0x273   :  { %1034 = vst [vmem:[%s1557_s3 + $0x30] sm:$0xff] %v987_v16  ;;  %v989_v18 = vpop.f32.mrb[11].mxu1  ;;  %1040 = vst [vmem:[%s1557_s3 + $0x60] sm:$0xff] %v886_v17  ;;  %v888_v19 = vpop.f32.mrb[15].mxu0 }
 0x274   :  { %1035 = vst [vmem:[%s1557_s3 + $0x38] sm:$0xff] %v989_v18  ;;  %1041 = vst [vmem:[%s1557_s3 + $0x68] sm:$0xff] %v888_v19 }
 0x276   :  { %v993_v20 = vpop.f32.mrb[12].mxu1  ;;  %v892_v21 = vpop.f32.mrb[16].mxu0 }
 0x277   :  { %1038 = vst [vmem:[%s1557_s3 + $0x50] sm:$0xff] %v993_v20  ;;  %v995_v22 = vpop.f32.mrb[13].mxu1  ;;  %1044 = vst [vmem:[%s1557_s3 + $0x80] sm:$0xff] %v892_v21  ;;  %v894_v23 = vpop.f32.mrb[17].mxu0 }
 0x278   :  { %1039 = vst [vmem:[%s1557_s3 + $0x58] sm:$0xff] %v995_v22  ;;  %1045 = vst [vmem:[%s1557_s3 + $0x88] sm:$0xff] %v894_v23 }
 0x27a   :  { %v999_v24 = vpop.f32.mrb[14].mxu1  ;;  %v898_v25 = vpop.f32.mrb[18].mxu0 }
 0x27b   :  { %1042 = vst [vmem:[%s1557_s3 + $0x70] sm:$0xff] %v999_v24  ;;  %v1001_v26 = vpop.f32.mrb[15].mxu1  ;;  %1048 = vst [vmem:[%s1557_s3 + $0xa0] sm:$0xff] %v898_v25  ;;  %v900_v27 = vpop.f32.mrb[19].mxu0 }
 0x27c   :  { %1043 = vst [vmem:[%s1557_s3 + $0x78] sm:$0xff] %v1001_v26  ;;  %1049 = vst [vmem:[%s1557_s3 + $0xa8] sm:$0xff] %v900_v27 }
 0x27e   :  { %v1005_v28 = vpop.f32.mrb[16].mxu1  ;;  %v904_v29 = vpop.f32.mrb[20].mxu0 }
 0x27f   :  { %1046 = vst [vmem:[%s1557_s3 + $0x90] sm:$0xff] %v1005_v28  ;;  %v1007_v30 = vpop.f32.mrb[17].mxu1  ;;  %1052 = vst [vmem:[%s1557_s3 + $0xc0] sm:$0xff] %v904_v29  ;;  %v906_v31 = vpop.f32.mrb[21].mxu0 }
 0x280   :  { %1047 = vst [vmem:[%s1557_s3 + $0x98] sm:$0xff] %v1007_v30  ;;  %1053 = vst [vmem:[%s1557_s3 + $0xc8] sm:$0xff] %v906_v31 }
 0x282   :  { %v1011_v32 = vpop.f32.mrb[18].mxu1  ;;  %v910_v33 = vpop.f32.mrb[22].mxu0 }
 0x283   :  { %1050 = vst [vmem:[%s1557_s3 + $0xb0] sm:$0xff] %v1011_v32  ;;  %v1013_v34 = vpop.f32.mrb[19].mxu1  ;;  %1056 = vst [vmem:[%s1557_s3 + $0xe0] sm:$0xff] %v910_v33  ;;  %v912_v35 = vpop.f32.mrb[23].mxu0 }
 0x284   :  { %1051 = vst [vmem:[%s1557_s3 + $0xb8] sm:$0xff] %v1013_v34  ;;  %1057 = vst [vmem:[%s1557_s3 + $0xe8] sm:$0xff] %v912_v35 }
 0x286   :  { %v1017_v36 = vpop.f32.mrb[20].mxu1 }
 0x287   :  { %1054 = vst [vmem:[%s1557_s3 + $0xd0] sm:$0xff] %v1017_v36  ;;  %v1019_v37 = vpop.f32.mrb[21].mxu1 }
 0x288   :  { %1055 = vst [vmem:[%s1557_s3 + $0xd8] sm:$0xff] %v1019_v37 }
 0x28a   :  { %v1023_v38 = vpop.f32.mrb[22].mxu1 }
 0x28b   :  { %1058 = vst [vmem:[%s1557_s3 + $0xf0] sm:$0xff] %v1023_v38  ;;  %v1025_v39 = vpop.f32.mrb[23].mxu1 }
 0x28c   :  { %1059 = vst [vmem:[%s1557_s3 + $0xf8] sm:$0xff] %v1025_v39 }
 0x28d   :  { %1064 = vsyncpa [#allocation3], 1 }
 0x28e   :  { %1065 = vsyncpa [#allocation5], 1 }

</bundles_post_ra>
